<compile_context>
chip_gen: v7x
topology: tpu7x:2x2x1
jax: 0.10.0
libtpu: 0.0.40
codegen_flags: <defaults>
</compile_context>

<pallas_src>
import functools

import jax
import jax.numpy as jnp
from jax.experimental import pallas as pl
from jax.experimental.pallas import tpu as pltpu

ALPHA = 0.25
GAMMA = 2
WEIGHTS = (1.0, 1.0)  # ImprovedFocalLoss(weights=[1, 1])


def _focal_elem(pred, tgt, *, alpha, gamma):
    """Elementwise focal loss (no reduction); pred/tgt are f32 arrays."""
    e = jnp.exp(-jnp.abs(pred))                      # shared between sigmoid & BCE (EUP)
    inv = pl.reciprocal(1.0 + e)                     # exact; approx=True is a free EUP swap
                                                     # if this epilogue ever hits the crit path
    s = jnp.where(pred >= 0.0, inv, e * inv)         # numerically stable sigmoid(pred)
    pt = (1.0 - s) * tgt + s * (1.0 - tgt)
    ptg = pt * pt if gamma == 2 else pt ** gamma     # gamma is a static module constant
    w = (alpha * tgt + (1.0 - alpha) * (1.0 - tgt)) * ptg
    # Stable BCE-with-logits: max(x,0) - x*z + log1p(exp(-|x|))
    bce = jnp.maximum(pred, 0.0) - pred * tgt + jnp.log1p(e)
    return bce * w


def _improved_focal_kernel(logit_ref, frame_ref, target_ref, out_ref, cmax_ref, *,
                           B, T_eff, C, fold, tb, tt, alpha, gamma, w0, w1):
    b = pl.program_id(0)
    t = pl.program_id(1)
    nt = pl.num_programs(1)

    # HBM/VMEM stream stays in the input dtype; cast only in-register (DMA-bound).
    frame = frame_ref[...].astype(jnp.float32)       # (tb, tt, fold*C)
    if T_eff % tt != 0:
        # Last T-tile is ragged: padded rows hold unspecified data -> mask to -inf.
        row = jax.lax.broadcasted_iota(jnp.int32, frame.shape, 1)
        frame = jnp.where(row < (T_eff - t * tt), frame, -jnp.inf)
    tile_max = jnp.max(frame, axis=1)                # (tb, fold*C), one reduce per tile

    @pl.when(t == 0)
    def _():
        cmax_ref[...] = tile_max

    @pl.when(t > 0)
    def _():
        cmax_ref[...] = jnp.maximum(cmax_ref[...], tile_max)

    # Epilogue only after the running max over ALL T-tiles is complete.  The out
    # block's index_map is constant in t (the inner "arbitrary" axis), so Pallas
    # keeps it resident and only writes it back after this last-t assignment.
    @pl.when(t == nt - 1)
    def _():
        logit = logit_ref[...].astype(jnp.float32)   # (tb, C)
        tgt = target_ref[...].astype(jnp.float32)    # (tb, C)
        cmax = cmax_ref[...]                         # (tb, fold*C)
        m = cmax[:, 0:C]                             # collapse folded time groups -> (tb, C)
        for k in range(1, fold):
            m = jnp.maximum(m, cmax[:, k * C:(k + 1) * C])
        combined = (w0 * _focal_elem(logit, tgt, alpha=alpha, gamma=gamma)
                    + w1 * _focal_elem(m, tgt, alpha=alpha, gamma=gamma))
        if B % tb != 0:
            # Last B-tile is ragged: zero the padded rows before the reduction.
            rowb = jax.lax.broadcasted_iota(jnp.int32, combined.shape, 0)
            combined = jnp.where(rowb < (B - b * tb), combined, 0.0)
        psum = jnp.sum(combined)                     # one reduction per B-tile
        # Lane-dense (8,128) scalar slab -> unmasked stores; wrapper reads [b,0,0].
        out_ref[...] = jnp.broadcast_to(psum, out_ref.shape)


def _round_up(x, m):
    return -(-x // m) * m


def _vmem_budget_bytes():
    try:
        cap = pltpu.get_tpu_info().vmem_capacity_bytes
    except Exception:
        cap = 64 * 1024 * 1024                       # assume v7x-sized VMEM if unknown
    # ~3/4 of physical, capped: ~48 MiB on v7x (64 MiB/TC), ~96-100 MiB on v5e/v6e.
    return int(min(100 * 1024 * 1024, (cap * 3) // 4))


def _derive_tiles(B, T_eff, C, C_eff, frame_itemsize, budget_bytes, tb=None, tt=None):
    lanes = _round_up(C, 128)                        # lane padding of the (tb, C) slabs
    lanes_eff = _round_up(C_eff, 128)                # lane padding of the streamed slab

    if tb is None:
        if B <= 8:
            tb = B                                   # full-dim block (no 8-divisibility needed)
        else:
            tb = min(64, _round_up(B, 8))
            # Keep nb >= 2 so the "parallel" B axis shards across v7x's 2 TensorCores.
            tb = min(tb, max(8, _round_up(pl.cdiv(B, 2), 8)))
    assert tb == B or tb % 8 == 0, "tb must be a multiple of 8 or the full B"
    nb = pl.cdiv(B, tb)

    if tt is None:
        # Fixed (non-streamed) VMEM cost, lane-padded & double-buffered.
        fixed = 2 * 2 * tb * lanes * 4               # logit + target blocks (2 bufs each)
        fixed += tb * lanes_eff * 4                  # running-max scratch (f32)
        fixed += 2 * 8 * 128 * 4                     # partial-sum output slab
        per_row = tb * lanes_eff * frame_itemsize    # one T row of one framewise buffer
        stream = min(max(budget_bytes - fixed, 16 * per_row),
                     16 * 1024 * 1024)               # <= ~8 MiB per framewise buffer
        tt = max(8, (stream // (2 * per_row)) // 8 * 8)
    if tt >= T_eff:
        tt = T_eff                                   # full-dim block is always legal
    assert tt == T_eff or tt % 8 == 0, "tt must be a multiple of 8 or the full T"
    nt = pl.cdiv(T_eff, tt)
    return tb, nb, tt, nt


def improved_focal_loss(logit, framewise_logit, target, *, weights=WEIGHTS,
                        alpha=ALPHA, gamma=GAMMA, tb=None, tt=None):
    """logit: (B, C), framewise_logit: (B, T, C), target: (B, C) -> scalar f32."""
    B, C = logit.shape
    Bf, T, Cf = framewise_logit.shape
    assert (Bf, Cf) == (B, C)

    target_f = target.astype(jnp.float32)            # target.float() (glue)

    # Fold time into lanes when C < 128: contiguous (free) reshape, f-times larger
    # effective T tile per VMEM byte, full lane utilization.  f must divide T so
    # there are no partial fold groups.
    fold = 1
    fmax = 128 // C
    if fmax >= 2:
        for d in range(min(fmax, T), 1, -1):
            if T % d == 0:
                fold = d
                break
    frame = (framewise_logit.reshape(B, T // fold, fold * C) if fold > 1
             else framewise_logit)
    T_eff, C_eff = T // fold, fold * C

    budget = _vmem_budget_bytes()
    tb, nb, tt, nt = _derive_tiles(B, T_eff, C, C_eff, frame.dtype.itemsize,
                                   budget, tb=tb, tt=tt)

    kernel = functools.partial(
        _improved_focal_kernel, B=B, T_eff=T_eff, C=C, fold=fold, tb=tb, tt=tt,
        alpha=alpha, gamma=gamma, w0=float(weights[0]), w1=float(weights[1]))

    grid_spec = pltpu.PrefetchScalarGridSpec(
        num_scalar_prefetch=0,
        grid=(nb, nt),
        in_specs=[
            pl.BlockSpec((tb, C), lambda b, t: (b, 0)),             # clip logits (resident)
            pl.BlockSpec((tb, tt, C_eff), lambda b, t: (b, t, 0)),  # framewise (streamed)
            pl.BlockSpec((tb, C), lambda b, t: (b, 0)),             # targets (resident)
        ],
        out_specs=pl.BlockSpec((1, 8, 128), lambda b, t: (b, 0, 0)),
        scratch_shapes=[pltpu.VMEM((tb, C_eff), jnp.float32)],      # running time-max
    )

    partials = pl.pallas_call(
        kernel,
        out_shape=jax.ShapeDtypeStruct((nb, 8, 128), jnp.float32),
        grid_spec=grid_spec,
        compiler_params=pltpu.CompilerParams(
            dimension_semantics=("parallel", "arbitrary"),          # B parallel, T reduction
            vmem_limit_bytes=budget,
        ),
    )(logit, frame, target_f)

    # Both focal means divide by the same global B*C; apply once to the fused sum.
    return jnp.sum(partials[:, 0, 0]) * (1.0 / float(B * C))


def _reference(logit, framewise_logit, target, *, weights=WEIGHTS, alpha=ALPHA, gamma=GAMMA):
    tgt = target.astype(jnp.float32)
    clip_max = jnp.max(framewise_logit.astype(jnp.float32), axis=1)

    def focal_mean(pred, t):
        pred = pred.astype(jnp.float32)
        s = jax.nn.sigmoid(pred)
        pt = (1.0 - s) * t + s * (1.0 - t)
        w = (alpha * t + (1.0 - alpha) * (1.0 - t)) * (pt ** gamma)
        bce = jnp.maximum(pred, 0.0) - pred * t + jnp.log1p(jnp.exp(-jnp.abs(pred)))
        return jnp.mean(bce * w)

    return weights[0] * focal_mean(logit, tgt) + weights[1] * focal_mean(clip_max, tgt)


if __name__ == "__main__":
    # Config 1: C=32 folds 2x into lanes (fold limited by T=50's divisors),
    # ragged B (13 -> 2 tiles of 8, masked) and ragged folded-T (25 -> 4 tiles
    # of 8 via the tt override, masked).
    k1, k2, k3 = jax.random.split(jax.random.PRNGKey(0), 3)
    B, T, C = 13, 50, 32
    logit1 = jax.random.normal(k1, (B, C), dtype=jnp.float32)
    frame1 = jax.random.normal(k2, (B, T, C), dtype=jnp.float32)
    target1 = jax.random.bernoulli(k3, 0.3, (B, C)).astype(jnp.int32)
    out1 = jax.block_until_ready(improved_focal_loss(logit1, frame1, target1, tt=8))
    ref1 = _reference(logit1, frame1, target1)
    assert jnp.allclose(out1, ref1, rtol=1e-4, atol=1e-6), (out1, ref1)

    # Config 2: no fold (C=96), bf16 framewise streamed un-upcast, exact tiling.
    k4, k5, k6 = jax.random.split(jax.random.PRNGKey(1), 3)
    B, T, C = 16, 24, 96
    logit2 = jax.random.normal(k4, (B, C), dtype=jnp.float32)
    frame2 = jax.random.normal(k5, (B, T, C), dtype=jnp.float32).astype(jnp.bfloat16)
    target2 = jax.random.bernoulli(k6, 0.3, (B, C)).astype(jnp.int32)
    out2 = jax.block_until_ready(improved_focal_loss(logit2, frame2, target2, tt=8))
    ref2 = _reference(logit2, frame2, target2)
    assert jnp.allclose(out2, ref2, rtol=1e-4, atol=1e-6), (out2, ref2)

    print("KERNEL_OK")
</pallas_src>

<mosaic_0001>
module attributes {stable_mosaic.version = 11 : i64} {
  func.func @_improved_focal_kernel(%arg0: i32, %arg1: i32, %arg2: memref<8x32xf32, #tpu.memory_space<vmem>>, %arg3: memref<8x8x64xf32, #tpu.memory_space<vmem>>, %arg4: memref<8x32xf32, #tpu.memory_space<vmem>>, %arg5: memref<1x8x128xf32, #tpu.memory_space<vmem>>, %arg6: memref<8x64xf32, #tpu.memory_space<vmem>>) attributes {dimension_semantics = [#tpu.dimension_semantics<parallel>, #tpu.dimension_semantics<arbitrary>], iteration_bounds = array<i64: 2, 4>, scalar_prefetch = 0 : i64, scratch_operands = 1 : i64, tpu.core_type = #tpu.core_type<tc>, window_params = [{transform_indices = @transform_0, window_bounds = array<i64: 8, 32>}, {transform_indices = @transform_1, window_bounds = array<i64: 8, 8, 64>}, {transform_indices = @transform_2, window_bounds = array<i64: 8, 32>}, {transform_indices = @transform_3, window_bounds = array<i64: 1, 8, 128>}]} {
    %c0 = arith.constant 0 : index
    %c0_0 = arith.constant 0 : index
    %c0_1 = arith.constant 0 : index
    %0 = vector.load %arg3[%c0, %c0_0, %c0_1] : memref<8x8x64xf32, #tpu.memory_space<vmem>>, vector<8x8x64xf32>
    %1 = tpu.iota {dimensions = array<i32: 1>} : vector<8x8x64xi32>
    %c8_i32 = arith.constant 8 : i32
    %2 = arith.muli %arg1, %c8_i32 : i32
    %c25_i32 = arith.constant 25 : i32
    %3 = arith.subi %c25_i32, %2 : i32
    %4 = vector.broadcast %3 : i32 to vector<8x8x64xi32>
    %5 = arith.cmpi slt, %1, %4 : vector<8x8x64xi32>
    %cst = arith.constant 0xFF800000 : f32
    %6 = vector.broadcast %cst : f32 to vector<8x8x64xf32>
    %7 = arith.select %5, %0, %6 : vector<8x8x64xi1>, vector<8x8x64xf32>
    %cst_2 = arith.constant dense<0xFF800000> : vector<8x64xf32>
    %8 = vector.multi_reduction <maximumf>, %7, %cst_2 [1] : vector<8x8x64xf32> to vector<8x64xf32>
    %c0_i32 = arith.constant 0 : i32
    %9 = arith.cmpi eq, %arg1, %c0_i32 : i32
    %10 = arith.extui %9 : i1 to i32
    %c0_i32_3 = arith.constant 0 : i32
    %11 = arith.cmpi ne, %10, %c0_i32_3 : i32
    scf.if %11 {
      %c0_7 = arith.constant 0 : index
      %c0_8 = arith.constant 0 : index
      %18 = vector.load %arg6[%c0_7, %c0_8] : memref<8x64xf32, #tpu.memory_space<vmem>>, vector<8x64xf32>
      tpu.vector_store %arg6[%c0_7, %c0_8], %8 {strides = array<i32>} : memref<8x64xf32, #tpu.memory_space<vmem>>, vector<8x64xf32>,
    } else {
    }
    %c0_i32_4 = arith.constant 0 : i32
    %12 = arith.cmpi sgt, %arg1, %c0_i32_4 : i32
    %13 = arith.extui %12 : i1 to i32
    %c0_i32_5 = arith.constant 0 : i32
    %14 = arith.cmpi ne, %13, %c0_i32_5 : i32
    scf.if %14 {
      %c0_7 = arith.constant 0 : index
      %c0_8 = arith.constant 0 : index
      %18 = vector.load %arg6[%c0_7, %c0_8] : memref<8x64xf32, #tpu.memory_space<vmem>>, vector<8x64xf32>
      %19 = arith.maximumf %18, %8 : vector<8x64xf32>
      %c0_9 = arith.constant 0 : index
      %c0_10 = arith.constant 0 : index
      %20 = vector.load %arg6[%c0_9, %c0_10] : memref<8x64xf32, #tpu.memory_space<vmem>>, vector<8x64xf32>
      tpu.vector_store %arg6[%c0_9, %c0_10], %19 {strides = array<i32>} : memref<8x64xf32, #tpu.memory_space<vmem>>, vector<8x64xf32>,
    } else {
    }
    %c3_i32 = arith.constant 3 : i32
    %15 = arith.cmpi eq, %arg1, %c3_i32 : i32
    %16 = arith.extui %15 : i1 to i32
    %c0_i32_6 = arith.constant 0 : i32
    %17 = arith.cmpi ne, %16, %c0_i32_6 : i32
    scf.if %17 {
      %c0_7 = arith.constant 0 : index
      %c0_8 = arith.constant 0 : index
      %18 = vector.load %arg2[%c0_7, %c0_8] : memref<8x32xf32, #tpu.memory_space<vmem>>, vector<8x32xf32>
      %c0_9 = arith.constant 0 : index
      %c0_10 = arith.constant 0 : index
      %19 = vector.load %arg4[%c0_9, %c0_10] : memref<8x32xf32, #tpu.memory_space<vmem>>, vector<8x32xf32>
      %c0_11 = arith.constant 0 : index
      %c0_12 = arith.constant 0 : index
      %20 = vector.load %arg6[%c0_11, %c0_12] : memref<8x64xf32, #tpu.memory_space<vmem>>, vector<8x64xf32>
      %21 = vector.extract_strided_slice %20 {offsets = [0, 0], sizes = [8, 32], strides = [1, 1]} : vector<8x64xf32> to vector<8x32xf32>
      %22 = vector.extract_strided_slice %20 {offsets = [0, 32], sizes = [8, 32], strides = [1, 1]} : vector<8x64xf32> to vector<8x32xf32>
      %23 = arith.maximumf %21, %22 : vector<8x32xf32>
      %24 = math.absf %18 : vector<8x32xf32>
      %cst_13 = arith.constant 0.000000e+00 : f32
      %25 = vector.broadcast %cst_13 : f32 to vector<8x32xf32>
      %26 = arith.subf %25, %24 : vector<8x32xf32>
      %27 = math.exp %26 : vector<8x32xf32>
      %cst_14 = arith.constant 1.000000e+00 : f32
      %28 = vector.broadcast %cst_14 : f32 to vector<8x32xf32>
      %29 = arith.addf %28, %27 : vector<8x32xf32>
      %30 = tpu.reciprocal %29 : vector<8x32xf32> -> vector<8x32xf32>
      %cst_15 = arith.constant 0.000000e+00 : f32
      %31 = vector.broadcast %cst_15 : f32 to vector<8x32xf32>
      %32 = arith.cmpf oge, %18, %31 : vector<8x32xf32>
      %33 = arith.mulf %27, %30 : vector<8x32xf32>
      %34 = arith.select %32, %30, %33 : vector<8x32xi1>, vector<8x32xf32>
      %cst_16 = arith.constant 1.000000e+00 : f32
      %35 = vector.broadcast %cst_16 : f32 to vector<8x32xf32>
      %36 = arith.subf %35, %34 : vector<8x32xf32>
      %37 = arith.mulf %36, %19 : vector<8x32xf32>
      %cst_17 = arith.constant 1.000000e+00 : f32
      %38 = vector.broadcast %cst_17 : f32 to vector<8x32xf32>
      %39 = arith.subf %38, %19 : vector<8x32xf32>
      %40 = arith.mulf %34, %39 : vector<8x32xf32>
      %41 = arith.addf %37, %40 : vector<8x32xf32>
      %42 = arith.mulf %41, %41 : vector<8x32xf32>
      %cst_18 = arith.constant 2.500000e-01 : f32
      %43 = vector.broadcast %cst_18 : f32 to vector<8x32xf32>
      %44 = arith.mulf %43, %19 : vector<8x32xf32>
      %cst_19 = arith.constant 1.000000e+00 : f32
      %45 = vector.broadcast %cst_19 : f32 to vector<8x32xf32>
      %46 = arith.subf %45, %19 : vector<8x32xf32>
      %cst_20 = arith.constant 7.500000e-01 : f32
      %47 = vector.broadcast %cst_20 : f32 to vector<8x32xf32>
      %48 = arith.mulf %47, %46 : vector<8x32xf32>
      %49 = arith.addf %44, %48 : vector<8x32xf32>
      %50 = arith.mulf %49, %42 : vector<8x32xf32>
      %cst_21 = arith.constant 0.000000e+00 : f32
      %51 = vector.broadcast %cst_21 : f32 to vector<8x32xf32>
      %52 = arith.maximumf %18, %51 : vector<8x32xf32>
      %53 = arith.mulf %18, %19 : vector<8x32xf32>
      %54 = arith.subf %52, %53 : vector<8x32xf32>
      %55 = math.log1p %27 : vector<8x32xf32>
      %56 = arith.addf %54, %55 : vector<8x32xf32>
      %57 = arith.mulf %56, %50 : vector<8x32xf32>
      %cst_22 = arith.constant 1.000000e+00 : f32
      %58 = vector.broadcast %cst_22 : f32 to vector<8x32xf32>
      %59 = arith.mulf %58, %57 : vector<8x32xf32>
      %60 = math.absf %23 : vector<8x32xf32>
      %cst_23 = arith.constant 0.000000e+00 : f32
      %61 = vector.broadcast %cst_23 : f32 to vector<8x32xf32>
      %62 = arith.subf %61, %60 : vector<8x32xf32>
      %63 = math.exp %62 : vector<8x32xf32>
      %cst_24 = arith.constant 1.000000e+00 : f32
      %64 = vector.broadcast %cst_24 : f32 to vector<8x32xf32>
      %65 = arith.addf %64, %63 : vector<8x32xf32>
      %66 = tpu.reciprocal %65 : vector<8x32xf32> -> vector<8x32xf32>
      %cst_25 = arith.constant 0.000000e+00 : f32
      %67 = vector.broadcast %cst_25 : f32 to vector<8x32xf32>
      %68 = arith.cmpf oge, %23, %67 : vector<8x32xf32>
      %69 = arith.mulf %63, %66 : vector<8x32xf32>
      %70 = arith.select %68, %66, %69 : vector<8x32xi1>, vector<8x32xf32>
      %cst_26 = arith.constant 1.000000e+00 : f32
      %71 = vector.broadcast %cst_26 : f32 to vector<8x32xf32>
      %72 = arith.subf %71, %70 : vector<8x32xf32>
      %73 = arith.mulf %72, %19 : vector<8x32xf32>
      %cst_27 = arith.constant 1.000000e+00 : f32
      %74 = vector.broadcast %cst_27 : f32 to vector<8x32xf32>
      %75 = arith.subf %74, %19 : vector<8x32xf32>
      %76 = arith.mulf %70, %75 : vector<8x32xf32>
      %77 = arith.addf %73, %76 : vector<8x32xf32>
      %78 = arith.mulf %77, %77 : vector<8x32xf32>
      %cst_28 = arith.constant 2.500000e-01 : f32
      %79 = vector.broadcast %cst_28 : f32 to vector<8x32xf32>
      %80 = arith.mulf %79, %19 : vector<8x32xf32>
      %cst_29 = arith.constant 1.000000e+00 : f32
      %81 = vector.broadcast %cst_29 : f32 to vector<8x32xf32>
      %82 = arith.subf %81, %19 : vector<8x32xf32>
      %cst_30 = arith.constant 7.500000e-01 : f32
      %83 = vector.broadcast %cst_30 : f32 to vector<8x32xf32>
      %84 = arith.mulf %83, %82 : vector<8x32xf32>
      %85 = arith.addf %80, %84 : vector<8x32xf32>
      %86 = arith.mulf %85, %78 : vector<8x32xf32>
      %cst_31 = arith.constant 0.000000e+00 : f32
      %87 = vector.broadcast %cst_31 : f32 to vector<8x32xf32>
      %88 = arith.maximumf %23, %87 : vector<8x32xf32>
      %89 = arith.mulf %23, %19 : vector<8x32xf32>
      %90 = arith.subf %88, %89 : vector<8x32xf32>
      %91 = math.log1p %63 : vector<8x32xf32>
      %92 = arith.addf %90, %91 : vector<8x32xf32>
      %93 = arith.mulf %92, %86 : vector<8x32xf32>
      %cst_32 = arith.constant 1.000000e+00 : f32
      %94 = vector.broadcast %cst_32 : f32 to vector<8x32xf32>
      %95 = arith.mulf %94, %93 : vector<8x32xf32>
      %96 = arith.addf %59, %95 : vector<8x32xf32>
      %97 = tpu.iota {dimensions = array<i32: 0>} : vector<8x32xi32>
      %c8_i32_33 = arith.constant 8 : i32
      %98 = arith.muli %arg0, %c8_i32_33 : i32
      %c13_i32 = arith.constant 13 : i32
      %99 = arith.subi %c13_i32, %98 : i32
      %100 = vector.broadcast %99 : i32 to vector<8x32xi32>
      %101 = arith.cmpi slt, %97, %100 : vector<8x32xi32>
      %cst_34 = arith.constant 0.000000e+00 : f32
      %102 = vector.broadcast %cst_34 : f32 to vector<8x32xf32>
      %103 = arith.select %101, %96, %102 : vector<8x32xi1>, vector<8x32xf32>
      %104 = vector.shape_cast %103 : vector<8x32xf32> to vector<1x8x32xf32>
      %cst_35 = arith.constant dense<0.000000e+00> : vector<1xf32>
      %105 = vector.multi_reduction <add>, %104, %cst_35 [1, 2] : vector<1x8x32xf32> to vector<1xf32>
      %106 = vector.shape_cast %105 : vector<1xf32> to vector<1x1x1xf32>
      %107 = vector.extract %106[0, 0, 0] : f32 from vector<1x1x1xf32>
      %108 = vector.broadcast %107 : f32 to vector<1x8x128xf32>
      %c0_36 = arith.constant 0 : index
      %c0_37 = arith.constant 0 : index
      %c0_38 = arith.constant 0 : index
      %109 = vector.load %arg5[%c0_36, %c0_37, %c0_38] : memref<1x8x128xf32, #tpu.memory_space<vmem>>, vector<1x8x128xf32>
      tpu.vector_store %arg5[%c0_36, %c0_37, %c0_38], %108 {strides = array<i32>} : memref<1x8x128xf32, #tpu.memory_space<vmem>>, vector<1x8x128xf32>,
    } else {
    }
    return
  }
  func.func @transform_0(%arg0: i32, %arg1: i32) -> (i32, i32) {
    %c0_i32 = arith.constant 0 : i32
    %c0_i32_0 = arith.constant 0 : i32
    return %arg0, %c0_i32 : i32, i32
  }
  func.func @transform_1(%arg0: i32, %arg1: i32) -> (i32, i32, i32) {
    %c0_i32 = arith.constant 0 : i32
    %c0_i32_0 = arith.constant 0 : i32
    return %arg0, %arg1, %c0_i32 : i32, i32, i32
  }
  func.func @transform_2(%arg0: i32, %arg1: i32) -> (i32, i32) {
    %c0_i32 = arith.constant 0 : i32
    %c0_i32_0 = arith.constant 0 : i32
    return %arg0, %c0_i32 : i32, i32
  }
  func.func @transform_3(%arg0: i32, %arg1: i32) -> (i32, i32, i32) {
    %c0_i32 = arith.constant 0 : i32
    %c0_i32_0 = arith.constant 0 : i32
    %c0_i32_1 = arith.constant 0 : i32
    return %arg0, %c0_i32, %c0_i32_0 : i32, i32, i32
  }
}

</mosaic_0001>

<bundles_post_ra>
// kernel: tpu_custom_call.1
= control target key start
LH: loop header
LB: loop body
LE: loop exit
PB: predicated region body
PF: predicated region fallthrough
CT: control target
= control target key end

     0   :  { %s1441_s0 = inlined_call_operand.vmem [shape: f32[13,32], index: 0, kind: input, shape index: {}]   ;;  %s1442_s1 = inlined_call_operand.vmem [shape: f32[13,25,64], index: 1, kind: input, shape index: {}]   ;;  %s1443_s2 = inlined_call_operand.vmem [shape: f32[13,32], index: 2, kind: input, shape index: {}]   ;;  %s1444_s3 = inlined_call_operand.hbm [shape: f32[2,8,128], index: 3, kind: output, shape index: {}]  }
   0x1   :  { %1448 = sst [smem:[#allocation10_spill]] %s1442_s1 }
   0x2   :  { %8 = vsyncpa [#allocation5], 0 }
   0x3   :  { %10 = vsyncpa [#allocation5 + $0x1], 0  ;;  %s1156_s12 = smov 0   ;;  %s1158_s13 = smov 0  }
   0x4   :  { %s1160_s14 = smov 0   ;;  %s1162_s15 = smov 0  }
   0x5   :  { %s1164_s16 = smov 0   ;;  %s1166_s17 = smov 0  }
   0x6   :  { %s1168_s18 = smov 0   ;;  %s1170_s19 = smov 0  }
   0x7   :  { %s1172_s20 = smov 0   ;;  %s1174_s21 = smov 0  }
   0x8 LB: > { %1449 = sst [smem:[#allocation7_spill]] %s1096_s20  ;;  %s755_s22 = sadd.s32 4294967295, %s1100_s21   ;;  %s1100_s21 = sphi %s1174_s21, %s16_s21   ;;  %s1096_s20 = sphi %s1172_s20, %s1465_s20   ;;  %s1092_s19 = sphi %s1170_s19, %s1472_s19   ;;  %s1088_s18 = sphi %s1168_s18, %s1463_s18   ;;  %s1084_s17 = sphi %s1166_s17, %s1471_s17   ;;  %s1080_s16 = sphi %s1164_s16, %s1470_s16   ;;  %s1076_s15 = sphi %s1162_s15, %s1469_s15   ;;  %s1072_s14 = sphi %s1160_s14, %s1468_s14   ;;  %s1068_s13 = sphi %s1158_s13, %s1467_s13   ;;  %s1064_s12 = sphi %s1156_s12, %s1466_s12  }
   0x9   : > { %s756_s23 = sadd.s32 4294967294, %s1100_s21   ;;  %s25_s24 = sadd.s32 1, %s1092_s19 }
   0xa   : > { %s28_s25 = sadd.s32 1, %s1096_s20  ;;  %p26_p0 = scmp.ge.s32.totalorder %s25_s24, 4 }
   0xb   : > { %s63_s26 = sadd.s32 1, %s1080_s16  ;;  %p70_p1 = scmp.ne.s32.totalorder %s1080_s16, %s1076_s15 }
   0xc   : > { %p71_p2 = scmp.eq.s32.totalorder %s1100_s21, 0  ;;  %s1474_s24 = smov (%p26_p0, %s25_s24), 0 }
   0xd   : > { %1450 = sst [smem:[#allocation8_spill]] %s1474_s24  ;;  %s1476_s25 = smov (!%p26_p0, %s28_s25), %s1096_s20 }
   0xe   : > { %s59_s27 = ssub.s32 %s1092_s19, %s1474_s24  ;;  %p1219_p3 = por %p71_p2, %p70_p1 }
   0xf   : > { %p30_p4 = scmp.ge.s32.totalorder %s1476_s25, 2  ;;  %s115_s29 = sadd.s32 1, %s1072_s14 }
  0x10   : > { %p125_p5 = scmp.ne.s32.totalorder %s1072_s14, %s1068_s13  ;;  %p126_p6 = scmp.eq.s32.totalorder %s755_s22, 7 }
  0x11   : > { %s1478_s25 = smov (%p30_p4, %s1476_s25), 0  ;;  %p131_p8 = scmp.ne.s32.totalorder %s1068_s13, %s1064_s12 }
  0x12   : > { %1452 = sst [smem:[#allocation9_spill]] %s1478_s25  ;;  %p1228_p7 = por %p126_p6, %p125_p5 }
  0x13   : > { %s58_s4 = ssub.s32 %s1096_s20, %s1478_s25  ;;  %p132_p9 = scmp.eq.s32.totalorder %s756_s23, 7 }
  0x14   : > { %s60_s5 = sor.u32 %s59_s27, %s58_s4  ;;  %p113_p10 = scmp.eq.s32.totalorder %s58_s4, 0 }
  0x15   : > { %p61_p11 = scmp.eq.s32.totalorder %s60_s5, 0  ;;  %p1236_p12 = por %p132_p9, %p131_p8 }
  0x16   : > { %s1241_s7 = scalar_select %p113_p10, %s1072_s14, %s115_s29  }
  0x17   : > { %s1244_s8 = scalar_select %p61_p11, %s1080_s16, %s63_s26  }
  0x18   : > { %p758_p13 = scmp.ge.s32.totalorder %s1100_s21, 8 }
  0x1a   : > { %148 = sbr.rel (%p758_p13) target bundleno = 89 (0x59), region = 16 }
  0x21   : > { %158 = sbr.rel (!%p1219_p3) target bundleno = 89 (0x59), region = 24  ;;  %s160_s9 = sand.u32 (%p1219_p3), 1, %s1080_s16  }
  0x22   : > { %s760_s10 = sshll.u32 (%p1219_p3), %s1096_s20, 3  ;;  %s759_s11 = sshll.u32 (%p1219_p3), %s160_s9, 6 }
  0x23   : > { %s164_s22 = ssub.s32 (%p1219_p3), 13, %s760_s10  ;;  %s789_s23 = sshll.u32 (%p1219_p3), %s1096_s20, 5 }
  0x24   : > { %p165_p0 = scmp.lt.s32.totalorder (%p1219_p3), %s164_s22, 8  ;;  %s170_s26 = sadd.s32 (%p1219_p3), %s1092_s19, %s789_s23 }
  0x25   : > { %s764_s29 = sshll.u32 (%p1219_p3), %s170_s26, 3  ;;  %s1455_s1 = sld [smem:[#allocation10_spill]] (%p1219_p3) }
  0x26   : > { %s1261_s25 = scalar_lea.vmem (%p1219_p3), [#allocation3], %s759_s11  }
  0x28   : > { %s1480_s22 = smov (!%p165_p0, %s164_s22), 8 }
  0x29   : > { %s761_s27 = sshll.u32 %s1480_s22, 7 }
  0x2a   : > { %p765_p1 = scmp.eq.s32.totalorder %s761_s27, 0 }
  0x2b   : > { %s1259_s28 = scalar_lea.vmem %s1455_s1, %s764_s29   ;;  %s1264_s9 = sshrl.u32 (!%p765_p1), %s1480_s22, 3 }
  0x2c   : > { %175 = sbr.rel (%p765_p1) target bundleno = 89 (0x59), region = 28  ;;  %p766_p2 = scmp.le.s32.totalorder (!%p765_p1), %s1264_s9, 0 }
  0x33   : > { %688 = sbr.rel (%p766_p2) target bundleno = 68 (0x44), region = 144  ;;  %s1456_s10 = smov (!%p766_p2), %s1261_s25 }
  0x34   : > { %s1457_s23 = smov (!%p766_p2), %s1259_s28  ;;  %s1273_s26 = smov (!%p766_p2), 0  }
  0x35   : > { %s1275_s29 = smov (!%p766_p2), 0  }
  0x3a LB: >> { %v251_v0 = vld [vmem:[%s1108_s23] sm:$0xff]  ;;  %s267_s11 = sadd.s32 1, %s1112_s26  ;;  %s245_s29 = sadd.s32 1, %s1116_s29   ;;  %s1116_s29 = sphi %s1275_s29, %s245_s29   ;;  %s1112_s26 = sphi %s1273_s26, %s1458_s26   ;;  %s1108_s23 = sphi %s1457_s23, %s272_s23   ;;  %s1104_s10 = sphi %s1456_s10, %s273_s10  }
  0x3b   : >> { %v253_v1 = vld [vmem:[%s1108_s23 + $0x20] sm:$0xff]  ;;  %252 = vst [vmem:[%s1104_s10] sm:$0xff] %v251_v0  ;;  %p268_p3 = scmp.ge.s32.totalorder %s267_s11, %s1264_s9  ;;  %p244_p4 = scmp.ge.s32.totalorder %s245_s29, %s1264_s9 }
  0x3c   : >> { %v255_v2 = vld [vmem:[%s1108_s23 + $0x40] sm:$0xff]  ;;  %254 = vst [vmem:[%s1104_s10 + $0x8] sm:$0xff] %v253_v1 }
  0x3d   : >> { %256 = vst [vmem:[%s1104_s10 + $0x10] sm:$0xff] %v255_v2  ;;  %v257_v3 = vld [vmem:[%s1108_s23 + $0x60] sm:$0xff]  ;;  %s1482_s11 = smov (%p268_p3, %s267_s11), 0  ;;  %247 = sbr.rel (!%p244_p4) target bundleno = 58 (0x3a), region = 150 }
  0x3e   : >> { %v259_v4 = vld [vmem:[%s1108_s23 + $0x80] sm:$0xff]  ;;  %258 = vst [vmem:[%s1104_s10 + $0x18] sm:$0xff] %v257_v3  ;;  %s767_s27 = sshll.u32 %s1482_s11, 8  ;;  %s768_s4 = sshll.u32 %s1482_s11, 6 }
  0x3f   : >> { %v261_v5 = vld [vmem:[%s1108_s23 + $0xa0] sm:$0xff]  ;;  %260 = vst [vmem:[%s1104_s10 + $0x20] sm:$0xff] %v259_v4  ;;  %s1458_s26 = smov %s1482_s11 }
  0x40   : >> { %262 = vst [vmem:[%s1104_s10 + $0x28] sm:$0xff] %v261_v5  ;;  %v263_v6 = vld [vmem:[%s1108_s23 + $0xc0] sm:$0xff] }
  0x41   : >> { %v265_v7 = vld [vmem:[%s1108_s23 + $0xe0] sm:$0xff]  ;;  %264 = vst [vmem:[%s1104_s10 + $0x30] sm:$0xff] %v263_v6  ;;  %s272_s23 = scalar_lea.vmem %s1259_s28, %s767_s27  }
  0x42   : >> { %266 = vst [vmem:[%s1104_s10 + $0x38] sm:$0xff] %v265_v7  ;;  %s273_s10 = scalar_lea.vmem %s1261_s25, %s768_s4 [#allocation3]  }
  0x44 PF: > { %s1297_s5 = sand.u32 7, %s1480_s22   ;;  %s790_s27 = sshll.u32 %s1264_s9, 8 }
  0x45   : > { %s1301_s4 = scalar_lea.vmem %s1259_s28, %s790_s27   ;;  %s791_s1 = sshll.u32 %s1264_s9, 6 }
  0x46   : > { %s280_s24 = scalar_lea.vmem %s1261_s25, %s791_s1 [#allocation3]   ;;  %p772_p5 = scmp.le.s32.totalorder %s1297_s5, 0 }
  0x47   : > { %s1118_s11 = smov (!%p772_p5), %s280_s24   ;;  %s1122_s29 = smov (!%p772_p5), %s1301_s4  }
  0x48   : > { %702 = sbr.rel (%p772_p5) target bundleno = 89 (0x59), region = 155  ;;  %s1126_s20 = smov (!%p772_p5), 0  }
  0x49   : > { %s1130_s10 = smov (!%p772_p5), 0  }
  0x4f LB: >> { %v290_v8 = vld [vmem:[%s1124_s29] sm:$0xff]  ;;  %s292_s22 = sadd.s32 1, %s1128_s20  ;;  %s284_s10 = sadd.s32 1, %s1132_s10   ;;  %s1132_s10 = sphi %s1130_s10, %s284_s10   ;;  %s1128_s20 = sphi %s1126_s20, %s1127_s20   ;;  %s1124_s29 = sphi %s1122_s29, %s297_s29   ;;  %s1120_s11 = sphi %s1118_s11, %s298_s11  }
  0x50   : >> { %291 = vst [vmem:[%s1120_s11] sm:$0xff] %v290_v8  ;;  %p293_p6 = scmp.ge.s32.totalorder %s292_s22, %s1297_s5  ;;  %p283_p8 = scmp.ge.s32.totalorder %s284_s10, %s1297_s5 }
  0x52   : >> { %s1484_s22 = smov (%p293_p6, %s292_s22), 0  ;;  %286 = sbr.rel (!%p283_p8) target bundleno = 79 (0x4f), region = 161 }
  0x53   : >> { %s773_s1 = sshll.u32 %s1484_s22, 5  ;;  %s774_s25 = sshll.u32 %s1484_s22, 3 }
  0x54   : >> { %s297_s29 = scalar_lea.vmem %s1301_s4, %s773_s1   ;;  %s298_s11 = scalar_lea.vmem %s280_s24, %s774_s25 [#allocation3]  }
  0x55   : >> { %s1127_s20 = smov %s1484_s22  }
  0x59 PF: > { %p775_p9 = scmp.ge.s32.totalorder %s1100_s21, 1  ;;  %p310_p10 = scmp.lt.s32.totalorder %s1100_s21, 9 }
  0x5b   : > { %p311_p11 = pnand %p775_p9, %p310_p10 }
  0x5c   : > { %s317_s20 = sand.u32 (!%p311_p11), 1, %s1076_s15   ;;  %s345_s28 = sand.u32 (!%p311_p11), 1, %s1068_s13   ;;  %v369_v9 = vlaneseq (!%p311_p11)  ;;  %vm383_vm1 = vcmask (!%p311_p11), 523264  }
  0x5d   : > { %314 = sbr.rel (%p311_p11) target bundleno = 539 (0x21b), region = 80  ;;  %s776_s9 = sshll.u32 (!%p311_p11), %s317_s20, 6 }
  0x5e   : > { %s1316_s24 = sshll.u32 (!%p311_p11), %s345_s28, 3  ;;  %v1318_v10 = vshrl.u32 (!%p311_p11), %v369_v9, 7  ;;  %p348_p13 = scmp.lt.s32.totalorder (!%p311_p11), %s1088_s18, 1 }
  0x5f   : > { %s319_s23 = scalar_lea.vmem (!%p311_p11), [#allocation3], %s776_s9  ;;  %s780_s26 = sshll.u32 (!%p311_p11), %s1084_s17, 3 }
  0x60   : > { %v361_v11 = vld [vmem:[%s319_s23] sm:$0xff] (!%p311_p11)  ;;  %v362_v12 = vld [vmem:[%s319_s23 + $0x8] sm:$0xff] (!%p311_p11)  ;;  %v363_v13 = vld [vmem:[%s319_s23 + $0x10] sm:$0xff] (!%p311_p11)  ;;  %s372_s5 = ssub.s32 (!%p311_p11), 25, %s780_s26  ;;  %s347_s25 = scalar_lea.vmem (!%p311_p11), [#allocation4], %s1316_s24 }
  0x61   : > { %v364_v14 = vld [vmem:[%s319_s23 + $0x18] sm:$0xff] (!%p311_p11)  ;;  %v365_v15 = vld [vmem:[%s319_s23 + $0x20] sm:$0xff] (!%p311_p11)  ;;  %v366_v16 = vld [vmem:[%s319_s23 + $0x28] sm:$0xff] (!%p311_p11)  ;;  %v373_v19 = vstv (!%p311_p11), %s372_s5  ;;  %p781_p0 = scmp.ne.s32.totalorder (!%p311_p11), %s1084_s17, 0 }
  0x62   : > { %v367_v17 = vld [vmem:[%s319_s23 + $0x30] sm:$0xff] (!%p311_p11)  ;;  %v368_v18 = vld [vmem:[%s319_s23 + $0x38] sm:$0xff] (!%p311_p11)  ;;  %vm1324_vm0 = vcmp.lt.s32.totalorder (!%p311_p11), %v1318_v10, %v373_v19 }
  0x63   : > { %v375_v21 = vsel (!%p311_p11), %vm1324_vm0, %v361_v11, -inf  ;;  %v376_v22 = vsel (!%p311_p11), %vm1324_vm0, %v362_v12, -inf  ;;  %v377_v23 = vsel (!%p311_p11), %vm1324_vm0, %v363_v13, -inf  ;;  %v378_v24 = vsel (!%p311_p11), %vm1324_vm0, %v364_v14, -inf }
  0x64   : > { %s349_s27 = scalar_select %p348_p13, %s1088_s18, 1  ;;  %v379_v25 = vsel %vm1324_vm0, %v365_v15, -inf  ;;  %v380_v26 = vsel %vm1324_vm0, %v366_v16, -inf  ;;  %v381_v27 = vsel %vm1324_vm0, %v367_v17, -inf  ;;  %v382_v28 = vsel %vm1324_vm0, %v368_v18, -inf }
  0x65   : > { %v384_v29 = vsel %vm383_vm1, %v375_v21, -inf  ;;  %v391_v30 = vsel %vm383_vm1, %v376_v22, -inf  ;;  %v398_v31 = vsel %vm383_vm1, %v377_v23, -inf  ;;  %v405_v32 = vsel %vm383_vm1, %v378_v24, -inf }
  0x66   : > { %s778_s15 = sshll.u32 %s349_s27, 3  ;;  %v385_v33 = vrot.slane %v384_v29, 4  ;;  %v392_v34 = vrot.slane %v391_v30, 4  ;;  %v399_v35 = vrot.slane %v398_v31, 4  ;;  %v406_v36 = vrot.slane %v405_v32, 4 }
  0x67   : > { %s1339_s29 = scalar_lea.vmem %s1441_s0, %s778_s15  ;;  %s1344_s1 = scalar_lea.vmem %s1443_s2, %s778_s15  ;;  %v412_v37 = vsel %vm383_vm1, %v379_v25, -inf  ;;  %v419_v38 = vsel %vm383_vm1, %v380_v26, -inf  ;;  %v426_v39 = vsel %vm383_vm1, %v381_v27, -inf  ;;  %v433_v40 = vsel %vm383_vm1, %v382_v28, -inf }
  0x68   : > { %v386_v41 = vmax.f32 %v384_v29, %v385_v33  ;;  %v393_v42 = vmax.f32 %v391_v30, %v392_v34  ;;  %v400_v43 = vmax.f32 %v398_v31, %v399_v35  ;;  %v407_v44 = vmax.f32 %v405_v32, %v406_v36 }
  0x69   : > { %v413_v45 = vrot.slane %v412_v37, 4  ;;  %v420_v46 = vrot.slane %v419_v38, 4  ;;  %v427_v47 = vrot.slane %v426_v39, 4  ;;  %v434_v48 = vrot.slane %v433_v40, 4 }
  0x6a   : > { %v387_v49 = vrot.slane %v386_v41, 2  ;;  %v394_v50 = vrot.slane %v393_v42, 2  ;;  %v401_v51 = vrot.slane %v400_v43, 2  ;;  %v408_v52 = vrot.slane %v407_v44, 2 }
  0x6b   : > { %v414_v53 = vmax.f32 %v412_v37, %v413_v45  ;;  %v421_v54 = vmax.f32 %v419_v38, %v420_v46  ;;  %v428_v55 = vmax.f32 %v426_v39, %v427_v47  ;;  %v435_v56 = vmax.f32 %v433_v40, %v434_v48 }
  0x6c   : > { %v388_v57 = vmax.f32 %v386_v41, %v387_v49  ;;  %v395_v58 = vmax.f32 %v393_v42, %v394_v50  ;;  %v402_v59 = vmax.f32 %v400_v43, %v401_v51  ;;  %v409_v60 = vmax.f32 %v407_v44, %v408_v52 }
  0x6d   : > { %v415_v61 = vrot.slane %v414_v53, 2  ;;  %v422_v62 = vrot.slane %v421_v54, 2  ;;  %v429_v63 = vrot.slane %v428_v55, 2  ;;  %v436_v0 = vrot.slane %v435_v56, 2  ;;  %443 = sbr.rel (%p781_p0) target bundleno = 124 (0x7c), region = 88 }
  0x6e   : > { %v389_v1 = vrot.slane %v388_v57, 1  ;;  %v396_v2 = vrot.slane %v395_v58, 1  ;;  %v403_v3 = vrot.slane %v402_v59, 1  ;;  %v410_v4 = vrot.slane %v409_v60, 1 }
  0x6f   : > { %v416_v5 = vmax.f32 %v414_v53, %v415_v61  ;;  %v423_v6 = vmax.f32 %v421_v54, %v422_v62  ;;  %v430_v7 = vmax.f32 %v428_v55, %v429_v63  ;;  %v437_v8 = vmax.f32 %v435_v56, %v436_v0 }
  0x70   : > { %v390_v9 = vmax.f32 %v388_v57, %v389_v1  ;;  %v397_v11 = vmax.f32 %v395_v58, %v396_v2  ;;  %v404_v12 = vmax.f32 %v402_v59, %v403_v3  ;;  %v411_v13 = vmax.f32 %v409_v60, %v410_v4 }
  0x71   : > { %v417_v14 = vrot.slane %v416_v5, 1  ;;  %v424_v15 = vrot.slane %v423_v6, 1  ;;  %v431_v16 = vrot.slane %v430_v7, 1  ;;  %v438_v17 = vrot.slane %v437_v8, 1 }
  0x72   : > { %vm452_vm2 = vcmask (!%p781_p0), 1041409   ;;  %vm454_vm3 = vcmask (!%p781_p0), 1042434   ;;  %vm456_vm4 = vcmask (!%p781_p0), 1043459   ;;  %vm458_vm5 = vcmask (!%p781_p0), 1044484  }
  0x73   : > { %v418_v18 = vmax.f32 %v416_v5, %v417_v14  ;;  %v425_v19 = vmax.f32 %v423_v6, %v424_v15  ;;  %v432_v20 = vmax.f32 %v430_v7, %v431_v16  ;;  %v439_v21 = vmax.f32 %v437_v8, %v438_v17 }
  0x74   : > { %v453_v22 = vsel %vm452_vm2, %v397_v11, %v390_v9  ;;  %vm460_vm6 = vcmask 1045509   ;;  %vm462_vm7 = vcmask 1046534   ;;  %vm464_vm8 = vcmask 1047559  }
  0x75   : > { %v455_v23 = vsel %vm454_vm3, %v404_v12, %v453_v22 }
  0x76   : > { %v457_v24 = vsel %vm456_vm4, %v411_v13, %v455_v23 }
  0x77   : > { %v459_v25 = vsel %vm458_vm5, %v418_v18, %v457_v24 }
  0x78   : > { %v461_v26 = vsel %vm460_vm6, %v425_v19, %v459_v25 }
  0x79   : > { %v463_v27 = vsel %vm462_vm7, %v432_v20, %v461_v26 }
  0x7a   : > { %v465_v28 = vsel %vm464_vm8, %v439_v21, %v463_v27 }
  0x7b   : > { %467 = vst.msk [vmem:[#allocation2] sm:$0xff] %vm383_vm1, %v465_v28 }
  0x7c PF: > { %p782_p1 = scmp.le.s32.totalorder %s1084_s17, 0 }
  0x7d   : > { %vm481_vm9 = vcmask (!%p782_p1), 1041409   ;;  %vm483_vm10 = vcmask (!%p782_p1), 1042434   ;;  %vm485_vm11 = vcmask (!%p782_p1), 1043459   ;;  %vm487_vm12 = vcmask (!%p782_p1), 1044484  }
  0x7e   : > { %471 = sbr.rel (%p782_p1) target bundleno = 136 (0x88), region = 92  ;;  %v482_v29 = vsel (!%p782_p1), %vm481_vm9, %v397_v11, %v390_v9  ;;  %vm489_vm13 = vcmask (!%p782_p1), 1045509   ;;  %vm491_vm14 = vcmask (!%p782_p1), 1046534   ;;  %vm493_vm15 = vcmask (!%p782_p1), 1047559  }
  0x7f   : > { %v484_v30 = vsel (!%p782_p1), %vm483_vm10, %v404_v12, %v482_v29 }
  0x80   : > { %v486_v31 = vsel (!%p782_p1), %vm485_vm11, %v411_v13, %v484_v30 }
  0x81   : > { %v488_v32 = vsel (!%p782_p1), %vm487_vm12, %v418_v18, %v486_v31 }
  0x82   : > { %v472_v33 = vld [vmem:[#allocation2] sm:$0xff] (!%p782_p1)  ;;  %v490_v34 = vsel (!%p782_p1), %vm489_vm13, %v425_v19, %v488_v32 }
  0x83   : > { %v492_v35 = vsel (!%p782_p1), %vm491_vm14, %v432_v20, %v490_v34 }
  0x84   : > { %v494_v36 = vsel (!%p782_p1), %vm493_vm15, %v439_v21, %v492_v35 }
  0x85   : > { %v496_v37 = vmax.f32 %v472_v33, %v494_v36 }
  0x87   : > { %497 = vst.msk [vmem:[#allocation2] sm:$0xff] %vm383_vm1, %v496_v37 }
  0x88 PF: > { %p783_p2 = scmp.ne.s32.totalorder %s1084_s17, 3 }
  0x89   : > { %s1134_s20 = smov (!%p783_p2), 96   ;;  %v502_v39 = vld [vmem:[%s1339_s29] sm:$0xff] (!%p783_p2)  ;;  %s784_s17 = sshll.u32 (!%p783_p2), %s1088_s18, 3  ;;  %vm578_vm5 = vcmask (!%p783_p2), 261120  }
  0x8a   : > { %501 = sbr.rel (%p783_p2) target bundleno = 515 (0x203), region = 96  ;;  %v510_v40 = vand.u32 (!%p783_p2), 2147483647, %v502_v39  ;;  %vm516_vm0 = vcmp.ge.f32.partialorder (!%p783_p2), %v502_v39, 0.0  ;;  %v503_v56 = vld [vmem:[%s1344_s1] sm:$0xff] (!%p783_p2)  ;;  %v529_v5 = vmax.f32 (!%p783_p2), %v502_v39, 0.0 }
  0x8b   : > { %v521_v58 = vsub.f32 (!%p783_p2), 1.0, %v503_v56  ;;  %v525_v0 = vmul.f32 (!%p783_p2), 0.25, %v503_v56  ;;  %v530_v6 = vmul.f32 (!%p783_p2), %v503_v56, %v502_v39  ;;  %s574_s9 = ssub.s32 (!%p783_p2), 13, %s784_s17 }
  0x8c   : > { %v511_v41 = vsub.f32 (!%p783_p2), 0.0, %v510_v40  ;;  %v575_v36 = vstv (!%p783_p2), %s574_s9 }
  0x8d   : > { %v526_v1 = vmul.f32 (!%p783_p2), 0.75, %v521_v58  ;;  %v531_v18 = vsub.f32 (!%p783_p2), %v529_v5, %v530_v6  ;;  %vm576_vm4 = vcmp.lt.s32.totalorder (!%p783_p2), %v1318_v10, %v575_v36 }
  0x8e   : > { %v504_v38 = vld [vmem:[#allocation2] sm:$0xff] (!%p783_p2)  ;;  %v512_v42 = vmul.f32 (!%p783_p2), 1.442695, %v511_v41 }
  0x8f   : > { %506 = vrot.lane.b32.xlu0 (!%p783_p2), %v504_v38, %s1134_s20  ;;  %v527_v14 = vadd.f32 (!%p783_p2), %v526_v1, %v525_v0 }
  0x90   : > { %946 = vpow2.f32 (!%p783_p2), %v512_v42 }
  0x9a   : > { %v947_v43 = vpop.eup %946 }
  0x9b   : > { %v514_v45 = vadd.f32 1.0, %v947_v43  ;;  %v535_v57 = vmul.f32 -0.5, %v947_v43  ;;  %v538_v63 = vand.u32 2147483647, %v947_v43 }
  0x9d   : > { %948 = vrcp.f32 %v514_v45  ;;  %v536_v61 = vadd.f32 1.0, %v535_v57  ;;  %vm1370_vm2 = vcmp.lt.f32.partialorder %v538_v63, 0.0004427343 }
  0x9f   : > { %v537_v9 = vmul.f32 %v947_v43, %v536_v61 }
  0xa7   : > { %v949_v50 = vpop.eup %948 }
  0xa8   : > { %v517_v51 = vmul.f32 %v949_v50, %v947_v43 }
  0xaa   : > { %v518_v54 = vsel %vm516_vm0, %v949_v50, %v517_v51 }
  0xab   : > { %v519_v55 = vsub.f32 1.0, %v518_v54  ;;  %v522_v60 = vmul.f32 %v521_v58, %v518_v54 }
  0xad   : > { %v520_v59 = vmul.f32 %v519_v55, %v503_v56 }
  0xaf   : > { %v523_v4 = vadd.f32 %v522_v60, %v520_v59 }
  0xb1   : > { %v524_v17 = vmul.f32 %v523_v4, %v523_v4 }
  0xb3   : > { %v528_v27 = vmul.f32 %v527_v14, %v524_v17 }
 0x101   : > { %v507_v44 = vpop.permute.xlu0 %506 }
 0x102   : > { %v509_v46 = vmax.f32 %v504_v38, %v507_v44 }
 0x104   : > { %v543_v47 = vand.u32 2147483647, %v509_v46  ;;  %vm549_vm1 = vcmp.ge.f32.partialorder %v509_v46, 0.0  ;;  %v558_v23 = vmax.f32 %v509_v46, 0.0  ;;  %v559_v24 = vmul.f32 %v509_v46, %v503_v56 }
 0x106   : > { %v544_v48 = vsub.f32 0.0, %v543_v47  ;;  %v560_v32 = vsub.f32 %v558_v23, %v559_v24 }
 0x108   : > { %v545_v49 = vmul.f32 1.442695, %v544_v48 }
 0x10a   : > { %950 = vpow2.f32 %v545_v49 }
 0x10b   : > { %952 = vlog2.f32 %v514_v45 }
 0x114   : > { %v951_v52 = vpop.eup %950 }
 0x115   : > { %v547_v53 = vadd.f32 1.0, %v951_v52  ;;  %v953_v62 = vpop.eup %952  ;;  %v564_v2 = vmul.f32 -0.5, %v951_v52  ;;  %v567_v19 = vand.u32 2147483647, %v951_v52 }
 0x116   : > { %v534_v8 = vmul.f32 0.6931472, %v953_v62 }
 0x117   : > { %954 = vrcp.f32 %v547_v53  ;;  %v565_v15 = vadd.f32 1.0, %v564_v2  ;;  %vm568_vm3 = vcmp.lt.f32.partialorder %v567_v19, 0.0004427343 }
 0x118   : > { %956 = vlog2.f32 %v547_v53  ;;  %v540_v20 = vsel %vm1370_vm2, %v537_v9, %v534_v8 }
 0x119   : > { %v566_v26 = vmul.f32 %v951_v52, %v565_v15  ;;  %v541_v28 = vadd.f32 %v540_v20, %v531_v18 }
 0x11b   : > { %v542_v33 = vmul.f32 %v541_v28, %v528_v27 }
 0x121   : > { %v955_v3 = vpop.eup %954 }
 0x122   : > { %v550_v7 = vmul.f32 %v955_v3, %v951_v52  ;;  %v957_v11 = vpop.eup %956 }
 0x123   : > { %v563_v21 = vmul.f32 0.6931472, %v957_v11 }
 0x124   : > { %v551_v13 = vsel %vm549_vm1, %v955_v3, %v550_v7 }
 0x125   : > { %v552_v16 = vsub.f32 1.0, %v551_v13  ;;  %v554_v22 = vmul.f32 %v551_v13, %v521_v58  ;;  %v569_v30 = vsel %vm568_vm3, %v566_v26, %v563_v21 }
 0x126   : > { %v570_v35 = vadd.f32 %v569_v30, %v560_v32 }
 0x127   : > { %v553_v25 = vmul.f32 %v552_v16, %v503_v56 }
 0x129   : > { %v555_v29 = vadd.f32 %v554_v22, %v553_v25 }
 0x12b   : > { %v556_v31 = vmul.f32 %v555_v29, %v555_v29 }
 0x12d   : > { %v557_v34 = vmul.f32 %v556_v31, %v527_v14 }
 0x12f   : > { %v571_v37 = vmul.f32 %v570_v35, %v557_v34 }
 0x131   : > { %v572_v38 = vadd.f32 %v571_v37, %v542_v33 }
 0x133   : > { %v577_v39 = vsel %vm576_vm4, %v572_v38, 0.0 }
 0x134   : > { %v579_v40 = vsel %vm578_vm5, %v577_v39, 0.0 }
 0x135   : > { %580 = vadd.xlane.f32.xlu0 %v579_v40 }
 0x1c2   : > { %v581_v41 = vpop.xlane.xlu0 %580 }
 0x1c3   : > { %v582_v42 = vrot.slane %v581_v41, 4 }
 0x1c5   : > { %v583_v43 = vadd.f32 %v582_v42, %v581_v41 }
 0x1c7   : > { %v584_v44 = vrot.slane %v583_v43, 2 }
 0x1c9   : > { %v585_v45 = vadd.f32 %v584_v44, %v583_v43 }
 0x1cb   : > { %v586_v46 = vrot.slane %v585_v45, 1 }
 0x1cd   : > { %v587_v47 = vadd.f32 %v586_v46, %v585_v45 }
 0x1cf   : > { %792 = vpush %v587_v47 }
 0x200   : > { %s793_s23 = spop %792 }
 0x201   : > { %v589_v48 = vstv %s793_s23 }
 0x202   : > { %590 = vst [vmem:[%s347_s25] sm:$0xff] %v589_v48 }
 0x203 PF: > { %s786_s26 = sshll.u32 %s1088_s18, 7  ;;  %s605_s4 = sshll.u32 %s347_s25, 4  ;;  %s606_s4 = int_to_ptr.vmem [resolvable:$true] %s605_s4 }
 0x204   : > { %s1384_s15 = scalar_lea.hbm %s1444_s3, %s786_s26  ;;  %s592_s11 = scalar_lea.sflag [#allocation5], %s345_s28 }
 0x205   : > { %s958_s29 = scalar_lea.vmem %s606_s4, 128  ;;  %s1135_s10 = smov [#allocation4]  }
 0x206   : > { %p959_p3 = scmp.ne.s32.totalorder %s606_s4, %s958_s29  ;;  %s962_s22 = sshll.u32 %s1135_s10, 4  ;;  %s963_s22 = int_to_ptr.vmem [resolvable:$false] %s962_s22 }
 0x207   : > { %s964_s1 = scalar_lea.vmem %s963_s22, 256  ;;  %p965_p6 = scmp.lt.s32.totalorder %s606_s4, %s963_s22 }
 0x208   : > { %p960_p4 = pnand %p959_p3, %p1228_p7  ;;  %p966_p8 = scmp.lt.s32.totalorder %s964_s1, %s958_s29 }
 0x20a   : > { %p961_p5 = pneg %p960_p4  ;;  %p967_p9 = por %p966_p8, %p965_p6 }
 0x20c   : > { %p968_p10 = pnand %p967_p9, %p961_p5 }
 0x20e   : > { %971 = shalt.err (!%p968_p10)
}
 0x20f   : > { %s972_s18 = scalar_lea.hbm %s1384_s15, 128  ;;  %s976_s25 = scalar_lea.hbm %s1444_s3, 256 }
 0x210   : > { %p973_p11 = scmp.ne.s32.totalorder %s1384_s15, %s972_s18  ;;  %p977_p1 = scmp.lt.u32.totalorder %s1384_s15, %s1444_s3 }
 0x211   : > { %p978_p2 = scmp.lt.u32.totalorder %s976_s25, %s972_s18  ;;  %p980_p4 = scmp.lt.u32.totalorder %s972_s18, %s1384_s15 }
 0x212   : > { %p974_p13 = pnand %p973_p11, %p1228_p7 }
 0x213   : > { %p979_p3 = por %p978_p2, %p977_p1 }
 0x214   : > { %p975_p0 = pneg %p974_p13 }
 0x215   : > { %p981_p5 = por %p980_p4, %p979_p3 }
 0x217   : > { %p982_p6 = pnand %p981_p5, %p975_p0 }
 0x219   : > { %985 = shalt.err (!%p982_p6)
}
 0x21a   : > { %794 = dma.vmem_to_hbm [thread:$0]  (%p1228_p7), %s606_s4, 128, %s1384_s15, %s592_s11  }
 0x21b PF: > { %p800_p8 = scmp.ge.s32.totalorder %s1100_s21, 2  ;;  %s617_s9 = sand.u32 1, %s1064_s12  }
 0x21c   : > { %s618_s23 = scalar_lea.sflag [#allocation5], %s617_s9 }
 0x21d   : > { %p797_p9 = pnand %p800_p8, %p1236_p12 }
 0x21f   : > { %1059 = dma.done.wait (!%p797_p9), %s618_s23, 128  }
 0x220   : > { %1061 = vsyncadd (!%p797_p9), %s618_s23, 4294967168  ;;  %s16_s21 = sadd.s32 1, %s1100_s21   ;;  %s1463_s18 = sld [smem:[#allocation7_spill]] }
 0x221   : > { %p13_p10 = scmp.ge.s32.totalorder %s16_s21, 10   ;;  %s1464_s30 = sld [smem:[#allocation8_spill]] }
 0x222   : > { %s1465_s20 = sld [smem:[#allocation9_spill]]  ;;  %s1466_s12 = smov %s1068_s13 }
 0x223   : > { %s1467_s13 = smov %s1072_s14  ;;  %s1468_s14 = smov %s1241_s7 }
 0x224   : > { %s1469_s15 = smov %s1080_s16  ;;  %s1470_s16 = smov %s1244_s8 }
 0x225   : > { %s1471_s17 = smov %s1092_s19  ;;  %15 = sbr.rel (!%p13_p10) target bundleno = 8 (0x8), region = 172 }
 0x227   : > { %s1472_s19 = smov %s1464_s30 }
 0x22c   :  { %623 = vsyncpa [#allocation5], 1 }
 0x22d   :  { %625 = vsyncpa [#allocation5 + $0x1], 1 }

</bundles_post_ra>
